<compile_context>
chip_gen: v6e
topology: v6e:2x2x1
jax: 0.10.0
libtpu: 0.0.40
codegen_flags: <defaults>
</compile_context>

<pallas_src>
import functools
import math

import jax
import jax.numpy as jnp
from jax import lax
from jax.experimental import pallas as pl
from jax.experimental.pallas import tpu as pltpu


_VMEM_LIMIT = 48 * 1024 * 1024  # safe on v5e/v6e (128 MiB phys) and v7x (64 MiB phys)


def _pick_tile(dim, target, align):
    """Largest multiple-of-`align` tile <= target that divides `dim`; else full dim."""
    if dim <= target:
        return dim
    t = (target // align) * align
    while t >= align:
        if dim % t == 0:
            return t
        t -= align
    return dim


# ---------------------------------------------------------------------------
# Tiled projection matmul (bf16 operands, f32 accumulation)
# ---------------------------------------------------------------------------
def _matmul_kernel(x_ref, w_ref, o_ref, acc_ref):
    @pl.when(pl.program_id(2) == 0)
    def _init():
        acc_ref[...] = jnp.zeros_like(acc_ref)

    acc_ref[...] += jnp.dot(x_ref[...], w_ref[...],
                            preferred_element_type=jnp.float32)

    @pl.when(pl.program_id(2) == pl.num_programs(2) - 1)
    def _finalize():
        o_ref[...] = acc_ref[...].astype(o_ref.dtype)


def linear_no_bias(x2d, w_t, out_dtype=jnp.float32, *, tm=256, tn=256, tk=512):
    """x2d: (M, K); w_t: (K, N) pre-transposed Linear weight. Returns (M, N) = x @ W^T."""
    M, K = x2d.shape
    K2, N = w_t.shape
    assert K == K2
    tm = _pick_tile(M, tm, 16)
    tn = _pick_tile(N, tn, 128)
    tk = _pick_tile(K, tk, 128)
    return pl.pallas_call(
        _matmul_kernel,
        out_shape=jax.ShapeDtypeStruct((M, N), out_dtype),
        grid=(M // tm, N // tn, K // tk),
        in_specs=[
            pl.BlockSpec((tm, tk), lambda i, j, k: (i, k)),
            pl.BlockSpec((tk, tn), lambda i, j, k: (k, j)),
        ],
        out_specs=pl.BlockSpec((tm, tn), lambda i, j, k: (i, j)),
        scratch_shapes=[pltpu.VMEM((tm, tn), jnp.float32)],
        compiler_params=pltpu.CompilerParams(
            dimension_semantics=("parallel", "parallel", "arbitrary"),
            vmem_limit_bytes=_VMEM_LIMIT,
        ),
    )(x2d, w_t)


# ---------------------------------------------------------------------------
# Rotary embedding applied once to K (per kv-head) -- removes per-query-head redundancy
# ---------------------------------------------------------------------------
def _rotary_kernel(x_ref, sin_ref, cos_ref, o_ref):
    x = x_ref[0, 0].astype(jnp.float32)               # (ts, D)
    half = x.shape[-1] // 2
    # rotate_half sign already folded into sin_ref (pre-signed sin table)
    x_rot = jnp.concatenate([x[:, half:], x[:, :half]], axis=-1)
    o_ref[0, 0] = (x * cos_ref[...] + x_rot * sin_ref[...]).astype(o_ref.dtype)


def apply_rotary(x, sin_signed, cos, *, ts=256):
    """x: (B, Hn, S, D); sin_signed/cos: (S, D). Returns rotated x (same dtype)."""
    B, Hn, S, D = x.shape
    ts = _pick_tile(S, ts, 16)
    return pl.pallas_call(
        _rotary_kernel,
        out_shape=jax.ShapeDtypeStruct(x.shape, x.dtype),
        grid=(B, Hn, S // ts),
        in_specs=[
            pl.BlockSpec((1, 1, ts, D), lambda b, h, s: (b, h, s, 0)),
            pl.BlockSpec((ts, D), lambda b, h, s: (s, 0)),
            pl.BlockSpec((ts, D), lambda b, h, s: (s, 0)),
        ],
        out_specs=pl.BlockSpec((1, 1, ts, D), lambda b, h, s: (b, h, s, 0)),
        compiler_params=pltpu.CompilerParams(
            dimension_semantics=("parallel", "parallel", "parallel"),
            vmem_limit_bytes=_VMEM_LIMIT,
        ),
    )(x, sin_signed, cos)


# ---------------------------------------------------------------------------
# Flash-style causal GQA attention (Q rotary fused at the first kv block)
# ---------------------------------------------------------------------------
def _flash_gqa_kernel(q_ref, k_ref, v_ref, sin_ref, cos_ref, o_ref,
                      qe_ref, m_ref, l_ref, acc_ref, *, scale, tq, tk):
    qi = pl.program_id(2)
    ki = pl.program_id(3)

    @pl.when(ki == 0)
    def _init():
        q = q_ref[0, 0].astype(jnp.float32)                      # (tq, D)
        half = q.shape[-1] // 2
        q_rot = jnp.concatenate([q[:, half:], q[:, :half]], axis=-1)
        qe = q * cos_ref[...] + q_rot * sin_ref[...]             # rotary (sign in sin)
        qe_ref[...] = (qe * scale).astype(qe_ref.dtype)          # fold 1/sqrt(D), cast bf16
        m_ref[...] = jnp.full_like(m_ref, -1e30)
        l_ref[...] = jnp.zeros_like(l_ref)
        acc_ref[...] = jnp.zeros_like(acc_ref)

    # causal block skipping: k-tiles entirely above the diagonal contribute nothing
    @pl.when(ki * tk < (qi + 1) * tq)
    def _compute():
        k = k_ref[0, 0]                                          # (tk, D) bf16, pre-rotated
        v = v_ref[0, 0]                                          # (tk, D) bf16
        # contract on D of both operands (no explicit transpose materialized)
        s = lax.dot_general(qe_ref[...], k, (((1,), (1,)), ((), ())),
                            preferred_element_type=jnp.float32)  # (tq, tk)
        q_pos = qi * tq + lax.broadcasted_iota(jnp.int32, (tq, tk), 0)
        k_pos = ki * tk + lax.broadcasted_iota(jnp.int32, (tq, tk), 1)
        s = jnp.where(k_pos <= q_pos, s, -1e30)                  # finite mask: no NaN hazard

        m_prev = m_ref[...]
        m_new = jnp.maximum(m_prev, jnp.max(s, axis=-1, keepdims=True))
        alpha = jnp.exp(m_prev - m_new)
        p = jnp.exp(s - m_new)
        l_ref[...] = alpha * l_ref[...] + jnp.sum(p, axis=-1, keepdims=True)
        acc_ref[...] = alpha * acc_ref[...] + jnp.dot(
            p.astype(v.dtype), v, preferred_element_type=jnp.float32)
        m_ref[...] = m_new

    @pl.when(ki == pl.num_programs(3) - 1)
    def _finalize():
        inv_l = pl.reciprocal(l_ref[...], approx=True)
        o_ref[0, 0] = (acc_ref[...] * inv_l).astype(o_ref.dtype)


def gqa_attention(q, k_rot, v, sin_signed, cos, *, scale, tq=256, tkv=256):
    """q: (B, H, S, D); k_rot/v: (B, Hkv, S, D); sin_signed/cos: (S, D) -> (B, H, S, D)."""
    B, H, S, D = q.shape
    Hkv = k_rot.shape[1]
    group = H // Hkv
    tq = _pick_tile(S, tq, 16)
    tkv = _pick_tile(S, tkv, 16)

    kernel = functools.partial(_flash_gqa_kernel, scale=scale, tq=tq, tk=tkv)
    return pl.pallas_call(
        kernel,
        out_shape=jax.ShapeDtypeStruct((B, H, S, D), q.dtype),
        grid=(B, H, S // tq, S // tkv),
        in_specs=[
            pl.BlockSpec((1, 1, tq, D), lambda b, h, i, j: (b, h, i, 0)),
            pl.BlockSpec((1, 1, tkv, D), lambda b, h, i, j: (b, h // group, j, 0)),
            pl.BlockSpec((1, 1, tkv, D), lambda b, h, i, j: (b, h // group, j, 0)),
            pl.BlockSpec((tq, D), lambda b, h, i, j: (i, 0)),
            pl.BlockSpec((tq, D), lambda b, h, i, j: (i, 0)),
        ],
        out_specs=pl.BlockSpec((1, 1, tq, D), lambda b, h, i, j: (b, h, i, 0)),
        scratch_shapes=[
            pltpu.VMEM((tq, D), q.dtype),       # rotated + pre-scaled Q (bf16)
            pltpu.VMEM((tq, 1), jnp.float32),   # running max
            pltpu.VMEM((tq, 1), jnp.float32),   # running sum
            pltpu.VMEM((tq, D), jnp.float32),   # output accumulator
        ],
        compiler_params=pltpu.CompilerParams(
            dimension_semantics=("parallel", "parallel", "parallel", "arbitrary"),
            vmem_limit_bytes=_VMEM_LIMIT,
        ),
    )(q, k_rot, v, sin_signed, cos)


# ---------------------------------------------------------------------------
# Module wrapper (plain-JAX glue around the Pallas kernels)
# ---------------------------------------------------------------------------
def rotary_tables(seq_len, head_dim):
    inv_freq = 1.0 / (10000.0 ** (jnp.arange(0, head_dim, 2, dtype=jnp.float32) / head_dim))
    t = jnp.arange(seq_len, dtype=jnp.float32)
    freqs = jnp.einsum("i,j->ij", t, inv_freq)          # (S, D/2)
    emb = jnp.concatenate([freqs, freqs], axis=-1)      # (S, D)
    return jnp.sin(emb), jnp.cos(emb)


def signed_sin(sin):
    """Fold the rotate_half sign flip into the sin table: concat(-sin1, sin2)."""
    half = sin.shape[-1] // 2
    return jnp.concatenate([-sin[:, :half], sin[:, half:]], axis=-1)


def prepare_params(torch_style_params):
    """Pre-transpose PyTorch Linear weights (N, K) -> (K, N) and cast to bf16, once."""
    return {name: w.T.astype(jnp.bfloat16) for name, w in torch_style_params.items()}


def group_query_attention(kparams, hidden_states, num_heads, num_kv_heads):
    B, S, hidden = hidden_states.shape
    head_dim = hidden // num_heads
    scale = 1.0 / math.sqrt(head_dim)

    x2d = hidden_states.reshape(B * S, hidden).astype(jnp.bfloat16)

    # projections: bf16 MXU operands, f32 accumulation in-kernel
    q = linear_no_bias(x2d, kparams["wq"], out_dtype=jnp.bfloat16)   # (B*S, H*D)
    k = linear_no_bias(x2d, kparams["wk"], out_dtype=jnp.bfloat16)   # (B*S, Hkv*D)
    v = linear_no_bias(x2d, kparams["wv"], out_dtype=jnp.bfloat16)   # (B*S, Hkv*D)

    # (B, heads, S, D) layout so the flash tiles' last-two dims are (S, D) and obey
    # the (8,128) block rule; the head transposes stay in XLA.
    q = q.reshape(B, S, num_heads, head_dim).transpose(0, 2, 1, 3)       # (B, H, S, D)
    k = k.reshape(B, S, num_kv_heads, head_dim).transpose(0, 2, 1, 3)    # (B, Hkv, S, D)
    v = v.reshape(B, S, num_kv_heads, head_dim).transpose(0, 2, 1, 3)    # (B, Hkv, S, D)

    sin, cos = rotary_tables(S, head_dim)
    sin_s = signed_sin(sin)

    # rotate K once per kv-head (Q rotary is fused inside the attention kernel)
    k = apply_rotary(k, sin_s, cos)

    out = gqa_attention(q, k, v, sin_s, cos, scale=scale)                # (B, H, S, D)

    out = out.transpose(0, 2, 1, 3).reshape(B * S, hidden)
    out = linear_no_bias(out, kparams["wo"], out_dtype=jnp.float32)
    return out.reshape(B, S, hidden)


# ---------------------------------------------------------------------------
# Pure-JAX f32 reference (mirrors the PyTorch forward) for a correctness check
# ---------------------------------------------------------------------------
def _reference(params, x, num_heads, num_kv_heads):
    B, S, hidden = x.shape
    D = hidden // num_heads
    scale = 1.0 / math.sqrt(D)
    q = x @ params["wq"].T
    k = x @ params["wk"].T
    v = x @ params["wv"].T
    q = q.reshape(B, S, num_heads, D)
    k = k.reshape(B, S, num_kv_heads, D)
    v = v.reshape(B, S, num_kv_heads, D)
    sin, cos = rotary_tables(S, D)
    sin = sin[None, :, None, :]
    cos = cos[None, :, None, :]

    def rot_half(t):
        t1, t2 = jnp.split(t, 2, axis=-1)
        return jnp.concatenate([-t2, t1], axis=-1)

    q = q * cos + rot_half(q) * sin
    k = k * cos + rot_half(k) * sin
    rep = num_heads // num_kv_heads
    k = jnp.repeat(k, rep, axis=2)
    v = jnp.repeat(v, rep, axis=2)
    q = q.transpose(0, 2, 1, 3)                     # (B,H,S,D)
    k = k.transpose(0, 2, 3, 1)                     # (B,H,D,S)
    v = v.transpose(0, 2, 1, 3)                     # (B,H,S,D)
    attn = (q @ k) * scale
    mask = jnp.where(jnp.triu(jnp.ones((S, S), bool), 1), -jnp.inf, 0.0)
    attn = attn + mask[None, None]
    attn = jax.nn.softmax(attn, axis=-1)
    out = attn @ v
    out = out.transpose(0, 2, 1, 3).reshape(B, S, hidden)
    return out @ params["wo"].T


# ---------------------------------------------------------------------------
if __name__ == "__main__":
    # small config: batch=2, seq=8, hidden=32, num_heads=4, num_kv_heads=2, head_dim=8
    B, S, hidden = 2, 8, 32
    num_heads, num_kv_heads = 4, 2
    head_dim = hidden // num_heads

    key = jax.random.PRNGKey(0)
    kx, kq, kk, kv, ko = jax.random.split(key, 5)

    x = jax.random.normal(kx, (B, S, hidden), dtype=jnp.float32)
    params = {
        "wq": 0.1 * jax.random.normal(kq, (hidden, hidden), dtype=jnp.float32),
        "wk": 0.1 * jax.random.normal(kk, (num_kv_heads * head_dim, hidden), dtype=jnp.float32),
        "wv": 0.1 * jax.random.normal(kv, (num_kv_heads * head_dim, hidden), dtype=jnp.float32),
        "wo": 0.1 * jax.random.normal(ko, (hidden, hidden), dtype=jnp.float32),
    }

    kparams = prepare_params(params)  # transpose + bf16 cast once, outside the forward

    out = group_query_attention(kparams, x, num_heads, num_kv_heads)
    out = jax.block_until_ready(out)

    ref = _reference(params, x, num_heads, num_kv_heads)
    assert out.shape == (B, S, hidden)
    max_err = float(jnp.max(jnp.abs(out - ref)))
    # bf16 MXU operands (f32 accumulation) -> compare against the f32 reference loosely
    assert jnp.allclose(out, ref, atol=5e-2, rtol=5e-2), f"mismatch vs reference (max abs err={max_err})"

    print("KERNEL_OK")
</pallas_src>

<mosaic_0001>
module attributes {stable_mosaic.version = 11 : i64} {
  func.func @_matmul_kernel(%arg0: i32, %arg1: i32, %arg2: i32, %arg3: memref<16x32xbf16, #tpu.memory_space<vmem>>, %arg4: memref<32x32xbf16, #tpu.memory_space<vmem>>, %arg5: memref<16x32xbf16, #tpu.memory_space<vmem>>, %arg6: memref<16x32xf32, #tpu.memory_space<vmem>>) attributes {dimension_semantics = [#tpu.dimension_semantics<parallel>, #tpu.dimension_semantics<parallel>, #tpu.dimension_semantics<arbitrary>], iteration_bounds = array<i64: 1, 1, 1>, scalar_prefetch = 0 : i64, scratch_operands = 1 : i64, tpu.core_type = #tpu.core_type<tc>, window_params = [{transform_indices = @transform_0, window_bounds = array<i64: 16, 32>}, {transform_indices = @transform_1, window_bounds = array<i64: 32, 32>}, {transform_indices = @transform_2, window_bounds = array<i64: 16, 32>}]} {
    %c0_i32 = arith.constant 0 : i32
    %0 = arith.cmpi eq, %arg2, %c0_i32 : i32
    %1 = arith.extui %0 : i1 to i32
    %c0_i32_0 = arith.constant 0 : i32
    %2 = arith.cmpi ne, %1, %c0_i32_0 : i32
    scf.if %2 {
      %cst_10 = arith.constant 0.000000e+00 : f32
      %12 = vector.broadcast %cst_10 : f32 to vector<16x32xf32>
      %c0_11 = arith.constant 0 : index
      %c0_12 = arith.constant 0 : index
      %13 = vector.load %arg6[%c0_11, %c0_12] : memref<16x32xf32, #tpu.memory_space<vmem>>, vector<16x32xf32>
      tpu.vector_store %arg6[%c0_11, %c0_12], %12 {strides = array<i32>} : memref<16x32xf32, #tpu.memory_space<vmem>>, vector<16x32xf32>,
    } else {
    }
    %c0 = arith.constant 0 : index
    %c0_1 = arith.constant 0 : index
    %3 = vector.load %arg6[%c0, %c0_1] : memref<16x32xf32, #tpu.memory_space<vmem>>, vector<16x32xf32>
    %c0_2 = arith.constant 0 : index
    %c0_3 = arith.constant 0 : index
    %4 = vector.load %arg3[%c0_2, %c0_3] : memref<16x32xbf16, #tpu.memory_space<vmem>>, vector<16x32xbf16>
    %c0_4 = arith.constant 0 : index
    %c0_5 = arith.constant 0 : index
    %5 = vector.load %arg4[%c0_4, %c0_5] : memref<32x32xbf16, #tpu.memory_space<vmem>>, vector<32x32xbf16>
    %cst = arith.constant dense<0.000000e+00> : vector<16x32xf32>
    %6 = tpu.matmul %4, %5, %cst {dimension_numbers = #tpu.dot_dimension_numbers<[1], [0], [0], [1], [0, 0, 1, 1], [], []>} : vector<16x32xbf16>, vector<32x32xbf16>, vector<16x32xf32> -> vector<16x32xf32>
    %7 = arith.addf %3, %6 : vector<16x32xf32>
    %c0_6 = arith.constant 0 : index
    %c0_7 = arith.constant 0 : index
    %8 = vector.load %arg6[%c0_6, %c0_7] : memref<16x32xf32, #tpu.memory_space<vmem>>, vector<16x32xf32>
    tpu.vector_store %arg6[%c0_6, %c0_7], %7 {strides = array<i32>} : memref<16x32xf32, #tpu.memory_space<vmem>>, vector<16x32xf32>,
    %c0_i32_8 = arith.constant 0 : i32
    %9 = arith.cmpi eq, %arg2, %c0_i32_8 : i32
    %10 = arith.extui %9 : i1 to i32
    %c0_i32_9 = arith.constant 0 : i32
    %11 = arith.cmpi ne, %10, %c0_i32_9 : i32
    scf.if %11 {
      %c0_10 = arith.constant 0 : index
      %c0_11 = arith.constant 0 : index
      %12 = vector.load %arg6[%c0_10, %c0_11] : memref<16x32xf32, #tpu.memory_space<vmem>>, vector<16x32xf32>
      %13 = arith.truncf %12 : vector<16x32xf32> to vector<16x32xbf16>
      %c0_12 = arith.constant 0 : index
      %c0_13 = arith.constant 0 : index
      %14 = vector.load %arg5[%c0_12, %c0_13] : memref<16x32xbf16, #tpu.memory_space<vmem>>, vector<16x32xbf16>
      tpu.vector_store %arg5[%c0_12, %c0_13], %13 {strides = array<i32>} : memref<16x32xbf16, #tpu.memory_space<vmem>>, vector<16x32xbf16>,
    } else {
    }
    return
  }
  func.func @transform_0(%arg0: i32, %arg1: i32, %arg2: i32) -> (i32, i32) {
    %c0_i32 = arith.constant 0 : i32
    return %arg0, %arg2 : i32, i32
  }
  func.func @transform_1(%arg0: i32, %arg1: i32, %arg2: i32) -> (i32, i32) {
    %c0_i32 = arith.constant 0 : i32
    return %arg2, %arg1 : i32, i32
  }
  func.func @transform_2(%arg0: i32, %arg1: i32, %arg2: i32) -> (i32, i32) {
    %c0_i32 = arith.constant 0 : i32
    return %arg0, %arg1 : i32, i32
  }
}

</mosaic_0001>

<bundles_post_ra>
// kernel: tpu_custom_call.1
= control target key start
LH: loop header
LB: loop body
LE: loop exit
PB: predicated region body
PF: predicated region fallthrough
CT: control target
= control target key end

     0   :  { %7 = vsyncpa [#allocation4], 0  ;;  %s296_s0 = inlined_call_operand.hbm [shape: bf16[16,32], index: 0, kind: input, shape index: {}]   ;;  %s297_s1 = inlined_call_operand.hbm [shape: bf16[32,32], index: 1, kind: input, shape index: {}]   ;;  %s298_s2 = inlined_call_operand.hbm [shape: bf16[16,32], index: 2, kind: output, shape index: {}]  }
   0x1   :  { %8 = vsyncpa [#allocation7], 0 }
   0x2   :  { %9 = vsyncpa [#allocation5], 0  ;;  %s251_s9 = smov [#allocation3]  }
   0x3   :  { %s15_s10 = sshll.u32 %s251_s9, 4  ;;  %s16_s10 = int_to_ptr.vmem [resolvable:$true] %s15_s10 }
   0x4   :  { %s193_s11 = scalar_lea.vmem %s16_s10, 128  ;;  %p198_p1 = scmp.lt.s32.totalorder %s16_s10, %s16_s10 }
   0x5   :  { %p194_p0 = scmp.ne.s32.totalorder %s16_s10, %s193_s11  ;;  %p199_p2 = scmp.lt.s32.totalorder %s193_s11, %s193_s11 }
   0x7   :  { %p200_p3 = por %p199_p2, %p198_p1 }
   0x9   :  { %p201_p4 = pnand %p200_p3, %p194_p0 }
   0xb   :  { %204 = shalt.err (!%p201_p4)
}
   0xc   :  { %s252_s12 = smov 64   ;;  %s253_s13 = smov 4  }
   0xd   :  { %21 = dma.hbm_to_vmem [thread:$0]  %s296_s0, 128, %s16_s10, [#allocation4], %s252_s12, %s252_s12, %s253_s13  }
   0xe   :  { %s254_s16 = smov [#allocation6]  }
   0xf   :  { %s27_s17 = sshll.u32 %s254_s16, 4  ;;  %s28_s17 = int_to_ptr.vmem [resolvable:$true] %s27_s17 }
  0x10   :  { %s213_s18 = scalar_lea.vmem %s28_s17, 256  ;;  %p218_p6 = scmp.lt.s32.totalorder %s28_s17, %s28_s17 }
  0x11   :  { %p214_p5 = scmp.ne.s32.totalorder %s28_s17, %s213_s18  ;;  %p219_p7 = scmp.lt.s32.totalorder %s213_s18, %s213_s18 }
  0x13   :  { %p220_p8 = por %p219_p7, %p218_p6 }
  0x15   :  { %p221_p9 = pnand %p220_p8, %p214_p5 }
  0x17   :  { %224 = shalt.err (!%p221_p9)
}
  0x18   :  { %33 = dma.hbm_to_vmem [thread:$0]  %s297_s1, 256, %s28_s17, [#allocation7], %s252_s12, %s252_s12, %s253_s13  }
  0x19   :  { %245 = dma.done.wait [#allocation4], 128  }
  0x1a   :  { %246 = vsyncadd [#allocation4], 4294967168 }
  0x1b   :  { %247 = dma.done.wait [#allocation7], 256  }
  0x1c   :  { %248 = vsyncadd [#allocation7], 4294967040  ;;  %vm45_vm0 = vcmask 261120   ;;  %v255_v0 = vmov 0.0   ;;  %vm256_vm1 = vmmov 0   ;;  %v182_v1 = vld [vmem:[#allocation6 + $0x8] sm:$0xff]  }
  0x1d   :  { %167 = vmatprep.subr.bf16.mxu0 %v255_v0  ;;  %171 = vmatprep.mubr.msk.bf16.mxu0 %vm256_vm1, %v255_v0  ;;  %46 = vst.msk [vmem:[#allocation2] sm:$0xff] %vm45_vm0, %v255_v0  ;;  %47 = vst.msk [vmem:[#allocation2 + $0x8] sm:$0xff] %vm45_vm0, %v255_v0  ;;  %v183_v2 = vld [vmem:[#allocation6] sm:$0xff]   ;;  %v184_v3 = vld [vmem:[#allocation3] sm:$0xff]   ;;  %vm135_vm2 = vcmask 257024   ;;  %s257_s0 = smov [#allocation8]  }
  0x1e   :  { %168 = vmatpush3.bf16.msra.mxu0 %v182_v1  ;;  %s143_s1 = sshll.u32 %s257_s0, 4  ;;  %s144_s1 = int_to_ptr.vmem [resolvable:$true] %s143_s1 }
  0x1f   :  { %169 = vmatprep.subr.bf16.mxu0 %v255_v0  ;;  %s225_s21 = scalar_lea.vmem %s144_s1, 128  ;;  %p230_p11 = scmp.lt.s32.totalorder %s144_s1, %s144_s1 }
  0x20   :  { %p226_p10 = scmp.ne.s32.totalorder %s144_s1, %s225_s21  ;;  %p231_p12 = scmp.lt.s32.totalorder %s225_s21, %s225_s21 }
  0x22   :  { %170 = vmatpush3.bf16.msra.mxu0 %v183_v2  ;;  %p232_p13 = por %p231_p12, %p230_p11 }
  0x24   :  { %v48_v4 = vld [vmem:[#allocation2] sm:$0xff]  ;;  %v49_v8 = vld [vmem:[#allocation2 + $0x8] sm:$0xff]  ;;  %p233_p0 = pnand %p232_p13, %p226_p10 }
  0x25   :  { %172 = vmatmul.mubr.msk.bf16.vlgmr.msra.gmra.mxu0 %vm45_vm0, %v184_v3 }
  0xe5   :  { %v111_v5 = vpop.f32.mrf.mxu0 }
  0xe6   :  { %v118_v6 = vadd.f32 %v111_v5, %v48_v4 }
  0xe7   :  { %v173_v7 = vpop.f32.mrf.mxu0 }
  0xe8   :  { %120 = vst.msk [vmem:[#allocation2] sm:$0xff] %vm45_vm0, %v118_v6 }
  0xe9   :  { %v114_v9 = vpop.f32.mrf.mxu0 }
  0xea   :  { %v119_v10 = vadd.f32 %v114_v9, %v49_v8 }
  0xeb   :  { %v174_v11 = vpop.f32.mrf.mxu0 }
  0xec   :  { %121 = vst.msk [vmem:[#allocation2 + $0x8] sm:$0xff] %vm45_vm0, %v119_v10 }
  0xef   :  { %v125_v12 = vld [vmem:[#allocation2] sm:$0xff] }
  0xf0   :  { %v162_v13 = vpack.c.bf16 %v125_v12, %v125_v12 }
  0xf2   :  { %136 = vst.msk [vmem:[#allocation8] sm:$0xf] %vm135_vm2, %v162_v13 }
  0xf3   :  { %v126_v14 = vld [vmem:[#allocation2 + $0x8] sm:$0xff] }
  0xf4   :  { %v163_v15 = vpack.c.bf16 %v126_v14, %v126_v14 }
  0xf6   :  { %137 = vst.msk [vmem:[#allocation8 + $0x4] sm:$0xf] %vm135_vm2, %v163_v15 }
  0xf7   :  { %236 = shalt.err (!%p233_p0)
}
  0xf8   :  { %149 = dma.vmem_to_hbm [thread:$0]  %s144_s1, 128, %s298_s2, [#allocation5], %s252_s12, %s252_s12, %s253_s13  }
  0xf9   :  { %249 = dma.done.wait [#allocation5], 128  }
  0xfa   :  { %250 = vsyncadd [#allocation5], 4294967168 }
  0xfb   :  { %153 = vsyncpa [#allocation4], 1 }
  0xfc   :  { %154 = vsyncpa [#allocation7], 1 }
  0xfd   :  { %155 = vsyncpa [#allocation5], 1 }

</bundles_post_ra>
